<compile_context>
chip_gen: v5e
topology: v5e:2x2
jax: 0.10.0
libtpu: 0.0.40
codegen_flags: <defaults>
</compile_context>

<pallas_src>
import functools
import math

import numpy as np
import jax
import jax.numpy as jnp
from jax.experimental import pallas as pl
from jax.experimental.pallas import tpu as pltpu


def _wl1_kernel(*refs, has_cw: bool, has_w: bool):
    """One grid step over a lane-dense (TR, L) tile, L = S*C."""
    it = iter(refs)
    inp_ref = next(it)                      # (TR, L)  native dtype
    tgt_ref = next(it)                      # (TR, L)  native dtype
    cw_ref = next(it) if has_cw else None   # (1, L)   f32 tiled code weights
    w_ref = next(it) if has_w else None     # (TR, S)  per-anchor weights
    ex_ref = next(it) if has_w else None    # (S, L)   0/1 lane-expansion matrix (f32)
    out_ref = next(it)                      # (TR, L)  native dtype

    x = inp_ref[...].astype(jnp.float32)    # cast right after load (v5e: no bf16 VPU)
    t = tgt_ref[...].astype(jnp.float32)
    t = jnp.where(jnp.isnan(t), x, t)       # NaN target -> use prediction (zero loss)
    diff = x - t
    if has_cw:
        diff = diff * cw_ref[...]           # (1, L) broadcasts over sublanes (before abs!)
    loss = jnp.abs(diff)
    if has_w:
        # Lane-repeat the per-anchor weights on the (otherwise idle) MXU:
        # ex[i, j] = 1 iff j // C == i, so (TR,S)@(S,L) -> out[:, j] = w[:, j // C].
        # HIGHEST keeps the f32 weights exact; the kernel is HBM-bound so it's free.
        w_full = jax.lax.dot_general(
            w_ref[...].astype(jnp.float32), ex_ref[...],
            dimension_numbers=(((1,), (0,)), ((), ())),
            precision=jax.lax.Precision.HIGHEST,
            preferred_element_type=jnp.float32)
        loss = loss * w_full
    out_ref[...] = loss.astype(out_ref.dtype)


# ~2 MiB/operand tiles: >=85% of HBM roofline on v5e/v6e and within v7x's 64 MiB
# VMEM / ~40 MiB scoped budget (do not blindly raise for v7x).
_TILE_BYTES_DEFAULT = 2 << 20


def _choose_fold(N, C):
    """Anchors folded per lane-row (S).  Prefer S with S*C % 128 == 0; otherwise any
    divisor of N giving a lane-dense row so no physical padding is ever needed."""
    S0 = 128 // math.gcd(C, 128)            # smallest S with (S*C) % 128 == 0
    if N % S0 == 0:
        return S0
    lo = -(-384 // C)                       # L >= ~384 lanes: dense stores
    hi = min(256, 2048 // C)                # keep the (S, L) expansion matrix small
    divs = set()
    i = 1
    while i * i <= N:
        if N % i == 0:
            divs.add(i)
            divs.add(N // i)
        i += 1
    cands = sorted(d for d in divs if lo <= d <= hi)
    if not cands:
        return None

    def util(s):
        L = s * C
        return L / (((L + 127) // 128) * 128)

    dense = [s for s in cands if util(s) >= 0.85]
    return min(dense) if dense else max(cands, key=util)


def _choose_row_tile(R, L, tile_bytes):
    """Rows per block: ~tile_bytes/operand, multiple of 32 (covers bf16/fp8 sublane
    packing), and >= 8 even blocks for large grids (balances v7x's two TensorCores)."""
    cap = max(32, (tile_bytes // (L * 4)) // 32 * 32)          # f32-equivalent budget
    if R <= cap:
        return R                                               # one block == full dim
    floor_rows = max(32, ((tile_bytes // 4) // (L * 4)) // 32 * 32)   # keep DMAs chunky
    nblk = max(8, -(-R // cap))
    nblk += nblk & 1                                           # even block count
    tr = math.ceil(math.ceil(R / nblk) / 32) * 32
    return max(32, min(cap, max(tr, floor_rows)))


@functools.partial(jax.jit, static_argnames=("tile_bytes",))
def weighted_l1_loss(inp, target, code_weights=None, weights=None,
                     tile_bytes=_TILE_BYTES_DEFAULT):
    """
    Args:
        inp:          (B, A, C) float — encoded predictions (f32 or bf16).
        target:       (B, A, C) float — regression targets (may contain NaN).
        code_weights: optional (C,) float — code-wise weights.
        weights:      optional (B, A) float — anchor-wise weights.
    Returns:
        (B, A, C) loss in the input dtype, no reduction (matches PyTorch forward).
    """
    B, A, C = inp.shape
    has_cw = code_weights is not None
    has_w = weights is not None
    if has_w:
        assert weights.shape[0] == B and weights.shape[1] == A
    N = B * A

    x2 = inp.reshape(N, C)                  # free, contiguous reshapes (native dtype)
    t2 = target.reshape(N, C)
    w1 = weights.reshape(N) if has_w else None

    S = _choose_fold(N, C)
    if S is None:
        # Rare fallback (no usable divisor of N, e.g. prime): pad < 128 rows.
        S = 128 // math.gcd(C, 128)
        n_pad = -(-N // S) * S
        pad = n_pad - N
        x2 = jnp.pad(x2, ((0, pad), (0, 0)))
        t2 = jnp.pad(t2, ((0, pad), (0, 0)))
        if has_w:
            w1 = jnp.pad(w1, (0, pad))
    else:
        n_pad = N
    L = S * C
    R = n_pad // S

    xr = x2.reshape(R, L)                   # lane-dense views (still free reshapes)
    tr_ = t2.reshape(R, L)
    wr = w1.reshape(R, S) if has_w else None

    TR = _choose_row_tile(R, L, tile_bytes)
    num_blocks = -(-R // TR)                # last row-block may be partial (masked)

    in_specs = [pl.BlockSpec((TR, L), lambda r: (r, 0)),     # input
                pl.BlockSpec((TR, L), lambda r: (r, 0))]     # target
    inputs = [xr, tr_]
    if has_cw:
        cw = jnp.tile(jnp.asarray(code_weights, jnp.float32).reshape(C), S).reshape(1, L)
        inputs.append(cw)
        in_specs.append(pl.BlockSpec((1, L), lambda r: (0, 0)))
    if has_w:
        ex = (np.arange(L)[None, :] // C == np.arange(S)[:, None]).astype(np.float32)
        inputs.append(wr)
        inputs.append(jnp.asarray(ex))      # (S, L) 0/1 constant — folded under jit
        in_specs.append(pl.BlockSpec((TR, S), lambda r: (r, 0)))
        in_specs.append(pl.BlockSpec((S, L), lambda r: (0, 0)))

    kernel = functools.partial(_wl1_kernel, has_cw=has_cw, has_w=has_w)
    out = pl.pallas_call(
        kernel,
        out_shape=jax.ShapeDtypeStruct((R, L), inp.dtype),
        grid_spec=pltpu.PrefetchScalarGridSpec(
            num_scalar_prefetch=0,
            grid=(num_blocks,),
            in_specs=in_specs,
            out_specs=pl.BlockSpec((TR, L), lambda r: (r, 0)),
        ),
        compiler_params=pltpu.CompilerParams(
            dimension_semantics=("parallel",),   # megacore-shardable (v7x 2 TCs)
            vmem_limit_bytes=40 * 1024 * 1024,
        ),
    )(*inputs)

    out = out.reshape(n_pad, C)
    if n_pad != N:                           # only on the rare pad-fallback path
        out = out[:N]
    return out.reshape(B, A, C)


def _reference(inp, target, code_weights, weights):
    """Pure-JAX mirror of the PyTorch WeightedL1Loss.forward (f32 math)."""
    x = inp.astype(jnp.float32)
    t = target.astype(jnp.float32)
    t = jnp.where(jnp.isnan(t), x, t)
    diff = x - t
    if code_weights is not None:
        diff = diff * jnp.asarray(code_weights, jnp.float32).reshape(1, 1, -1)
    loss = jnp.abs(diff)
    if weights is not None:
        loss = loss * weights.astype(jnp.float32)[..., None]
    return loss


if __name__ == "__main__":
    key = jax.random.PRNGKey(0)

    # (B, A, C, dtype, use_cw, use_w, tile_bytes_override, tol)
    cases = [
        (2, 96, 7, jnp.float32, True, True, None, 1e-6),    # ragged vs 128 -> divisor fold, zero padding
        (2, 64, 8, jnp.float32, True, True, None, 1e-6),    # exact fold S=16 (L=128)
        (2, 96, 7, jnp.float32, False, False, None, 1e-6),  # both optional weight streams skipped
        (1, 13, 7, jnp.float32, True, True, None, 1e-6),    # no usable divisor -> rare pad fallback
        (2, 128, 8, jnp.bfloat16, True, True, None, 2e-2),  # native bf16 I/O (no f32 round-trip)
        (4, 520, 8, jnp.float32, True, True, 16 * 1024, 1e-6),  # multi-block grid + ragged last row-block
    ]
    for i, (B, A, C, dtype, use_cw, use_w, tb, tol) in enumerate(cases):
        k1, k2, k3 = jax.random.split(jax.random.fold_in(key, i), 3)
        inp = jax.random.normal(k1, (B, A, C), dtype)
        target = jax.random.normal(k2, (B, A, C), dtype)
        target = target.at[0, 0, 0].set(jnp.nan)             # exercise the isnan path
        cw = jnp.linspace(0.5, 1.5, C, dtype=jnp.float32) if use_cw else None
        w = jax.random.uniform(k3, (B, A), jnp.float32) if use_w else None

        kwargs = {} if tb is None else {"tile_bytes": tb}
        out = weighted_l1_loss(inp, target, code_weights=cw, weights=w, **kwargs)
        out = jax.block_until_ready(out)

        assert out.shape == (B, A, C) and out.dtype == dtype, (out.shape, out.dtype)
        ref = _reference(inp, target, cw, w)
        err = float(jnp.max(jnp.abs(out.astype(jnp.float32) - ref)))
        assert bool(jnp.allclose(out.astype(jnp.float32), ref, atol=tol, rtol=tol)), \
            f"case {i}: max abs err = {err}"

    print("KERNEL_OK")
</pallas_src>

<mosaic_0001>
module attributes {stable_mosaic.version = 11 : i64} {
  func.func @_wl1_kernel(%arg0: i32, %arg1: memref<3x448xf32, #tpu.memory_space<vmem>>, %arg2: memref<3x448xf32, #tpu.memory_space<vmem>>, %arg3: memref<1x448xf32, #tpu.memory_space<vmem>>, %arg4: memref<3x64xf32, #tpu.memory_space<vmem>>, %arg5: memref<64x448xf32, #tpu.memory_space<vmem>>, %arg6: memref<3x448xf32, #tpu.memory_space<vmem>>) attributes {dimension_semantics = [#tpu.dimension_semantics<parallel>], iteration_bounds = array<i64: 1>, scalar_prefetch = 0 : i64, scratch_operands = 0 : i64, tpu.core_type = #tpu.core_type<tc>, window_params = [{transform_indices = @transform_0, window_bounds = array<i64: 3, 448>}, {transform_indices = @transform_1, window_bounds = array<i64: 3, 448>}, {pipeline_mode = #tpu.pipeline_mode<synchronous>, transform_indices = @transform_2, window_bounds = array<i64: 1, 448>}, {transform_indices = @transform_3, window_bounds = array<i64: 3, 64>}, {pipeline_mode = #tpu.pipeline_mode<synchronous>, transform_indices = @transform_4, window_bounds = array<i64: 64, 448>}, {transform_indices = @transform_5, window_bounds = array<i64: 3, 448>}]} {
    %c0 = arith.constant 0 : index
    %c0_0 = arith.constant 0 : index
    %0 = vector.load %arg1[%c0, %c0_0] : memref<3x448xf32, #tpu.memory_space<vmem>>, vector<3x448xf32>
    %c0_1 = arith.constant 0 : index
    %c0_2 = arith.constant 0 : index
    %1 = vector.load %arg2[%c0_1, %c0_2] : memref<3x448xf32, #tpu.memory_space<vmem>>, vector<3x448xf32>
    %2 = arith.cmpf one, %1, %1 : vector<3x448xf32>
    %3 = arith.select %2, %0, %1 : vector<3x448xi1>, vector<3x448xf32>
    %4 = arith.subf %0, %3 : vector<3x448xf32>
    %c0_3 = arith.constant 0 : index
    %c0_4 = arith.constant 0 : index
    %5 = vector.load %arg3[%c0_3, %c0_4] : memref<1x448xf32, #tpu.memory_space<vmem>>, vector<1x448xf32>
    %6 = vector.broadcast %5 : vector<1x448xf32> to vector<3x448xf32>
    %7 = arith.mulf %4, %6 : vector<3x448xf32>
    %8 = math.absf %7 : vector<3x448xf32>
    %c0_5 = arith.constant 0 : index
    %c0_6 = arith.constant 0 : index
    %9 = vector.load %arg4[%c0_5, %c0_6] : memref<3x64xf32, #tpu.memory_space<vmem>>, vector<3x64xf32>
    %c0_7 = arith.constant 0 : index
    %c0_8 = arith.constant 0 : index
    %10 = vector.load %arg5[%c0_7, %c0_8] : memref<64x448xf32, #tpu.memory_space<vmem>>, vector<64x448xf32>
    %cst = arith.constant dense<0.000000e+00> : vector<3x448xf32>
    %11 = tpu.matmul %9, %10, %cst {dimension_numbers = #tpu.dot_dimension_numbers<[1], [0], [0], [1], [0, 0, 1, 1], [], []>, precision = #tpu.contract_precision<fp32>} : vector<3x64xf32>, vector<64x448xf32>, vector<3x448xf32> -> vector<3x448xf32>
    %12 = arith.mulf %8, %11 : vector<3x448xf32>
    %c0_9 = arith.constant 0 : index
    %c0_10 = arith.constant 0 : index
    %13 = vector.load %arg6[%c0_9, %c0_10] : memref<3x448xf32, #tpu.memory_space<vmem>>, vector<3x448xf32>
    tpu.vector_store %arg6[%c0_9, %c0_10], %12 {strides = array<i32>} : memref<3x448xf32, #tpu.memory_space<vmem>>, vector<3x448xf32>,
    return
  }
  func.func @transform_0(%arg0: i32) -> (i32, i32) {
    %c0_i32 = arith.constant 0 : i32
    %c0_i32_0 = arith.constant 0 : i32
    return %arg0, %c0_i32 : i32, i32
  }
  func.func @transform_1(%arg0: i32) -> (i32, i32) {
    %c0_i32 = arith.constant 0 : i32
    %c0_i32_0 = arith.constant 0 : i32
    return %arg0, %c0_i32 : i32, i32
  }
  func.func @transform_2(%arg0: i32) -> (i32, i32) {
    %c0_i32 = arith.constant 0 : i32
    %c0_i32_0 = arith.constant 0 : i32
    %c0_i32_1 = arith.constant 0 : i32
    return %c0_i32, %c0_i32_0 : i32, i32
  }
  func.func @transform_3(%arg0: i32) -> (i32, i32) {
    %c0_i32 = arith.constant 0 : i32
    %c0_i32_0 = arith.constant 0 : i32
    return %arg0, %c0_i32 : i32, i32
  }
  func.func @transform_4(%arg0: i32) -> (i32, i32) {
    %c0_i32 = arith.constant 0 : i32
    %c0_i32_0 = arith.constant 0 : i32
    %c0_i32_1 = arith.constant 0 : i32
    return %c0_i32, %c0_i32_0 : i32, i32
  }
  func.func @transform_5(%arg0: i32) -> (i32, i32) {
    %c0_i32 = arith.constant 0 : i32
    %c0_i32_0 = arith.constant 0 : i32
    return %arg0, %c0_i32 : i32, i32
  }
}

</mosaic_0001>

<bundles_post_ra>
// kernel: tile.8
= control target key start
LH: loop header
LB: loop body
LE: loop exit
PB: predicated region body
PF: predicated region fallthrough
CT: control target
= control target key end

     0   :  { %s64_s0 = inlined_call_operand.vmem [shape: f32[7], index: 0, kind: input, shape index: {}]   ;;  %s65_s1 = inlined_call_operand.vmem [shape: f32[64,7], index: 1, kind: output, shape index: {}]  }
   0x1   :  { %v4_v0 = vld [vmem:[%s64_s0] ss:$0 sm:$0xff] }
   0x2   :  { %5 = vst [vmem:[%s65_s1] sm:$0xff] %v4_v0 }
   0x3   :  { %20 = vst [vmem:[%s65_s1 + $0x8] sm:$0xff] %v4_v0 }
   0x4   :  { %21 = vst [vmem:[%s65_s1 + $0x10] sm:$0xff] %v4_v0 }
   0x5   :  { %22 = vst [vmem:[%s65_s1 + $0x18] sm:$0xff] %v4_v0 }
   0x6   :  { %23 = vst [vmem:[%s65_s1 + $0x20] sm:$0xff] %v4_v0 }
   0x7   :  { %24 = vst [vmem:[%s65_s1 + $0x28] sm:$0xff] %v4_v0 }
   0x8   :  { %25 = vst [vmem:[%s65_s1 + $0x30] sm:$0xff] %v4_v0 }
   0x9   :  { %26 = vst [vmem:[%s65_s1 + $0x38] sm:$0xff] %v4_v0 }

// kernel: tile.9
= control target key start
LH: loop header
LB: loop body
LE: loop exit
PB: predicated region body
PF: predicated region fallthrough
CT: control target
= control target key end

     0   :  { %vm36_vm0 = vcmask 48128   ;;  %vm9_vm1 = vcmask 15360   ;;  %s605_s14 = smov 122   ;;  %s606_s15 = smov 126   ;;  %vm22_vm2 = vcmask 31744   ;;  %vm3_vm3 = vcmask 56320   ;;  %s894_s0 = inlined_call_operand.vmem [shape: f32[64,7], index: 0, kind: input, shape index: {}]   ;;  %s895_s1 = inlined_call_operand.vmem [shape: f32[1,448], index: 1, kind: output, shape index: {}]  }
   0x1   :  { %v477_v0 = vld [vmem:[%s894_s0 + $0x36] sm:$0x1]   ;;  %v473_v3 = vld [vmem:[%s894_s0 + $0x12] sm:$0x1]   ;;  %v480_v6 = vld [vmem:[%s894_s0 + $0x23] sm:$0x1]  }
   0x2   :  { %v478_v1 = vld [vmem:[%s894_s0 + $0x36] sm:$0x1]   ;;  %v474_v4 = vld [vmem:[%s894_s0 + $0x12] sm:$0x1]   ;;  %v475_v7 = vld [vmem:[%s894_s0 + $0x24] sm:$0x1]  }
   0x3   :  { %v37_v2 = vsel %vm36_vm0, %v478_v1, %v477_v0  ;;  %v10_v5 = vsel %vm9_vm1, %v474_v4, %v473_v3  ;;  %v476_v8 = vld [vmem:[%s894_s0 + $0x24] sm:$0x1]   ;;  %s607_s22 = smov 117   ;;  %v479_v9 = vld [vmem:[%s894_s0 + $0x11] sm:$0x1]   ;;  %s608_s25 = smov 119  }
   0x4   :  { %38 = vrot.lane.b32.xlu1 %v37_v2, %s605_s14  ;;  %11 = vrot.lane.b32.xlu0 %v10_v5, %s606_s15  ;;  %v23_v10 = vsel %vm22_vm2, %v476_v8, %v475_v7  ;;  %v481_v11 = vld [vmem:[%s894_s0 + $0x35] sm:$0x1]   ;;  %s609_s28 = smov 124   ;;  %s610_s29 = smov 115   ;;  %v483_v12 = vld [vmem:[%s894_s0 + $0x22] sm:$0x1]  }
   0x5   :  { %54 = vrot.lane.b32.xlu2 %v480_v6, %s607_s22  ;;  %v482_v13 = vld [vmem:[%s894_s0 + $0x10] sm:$0x1]   ;;  %s611_s5 = smov 110   ;;  %v484_v14 = vld [vmem:[%s894_s0 + $0x34] sm:$0x1]   ;;  %s612_s8 = smov 112  }
   0x6   :  { %s613_s9 = smov 108   ;;  %v486_v15 = vld [vmem:[%s894_s0 + $0x21] sm:$0x1]   ;;  %v485_v16 = vld [vmem:[%s894_s0 + $0xf] sm:$0x1]   ;;  %s614_s14 = smov 103  }
   0x7   :  { %v487_v17 = vld [vmem:[%s894_s0 + $0x33] sm:$0x1]   ;;  %s615_s17 = smov 105   ;;  %s616_s18 = smov 101   ;;  %v489_v18 = vld [vmem:[%s894_s0 + $0x20] sm:$0x1]  }
   0x8   :  { %v488_v19 = vld [vmem:[%s894_s0 + $0xe] sm:$0x1]   ;;  %s617_s23 = smov 96   ;;  %v490_v20 = vld [vmem:[%s894_s0 + $0x32] sm:$0x1]   ;;  %s618_s26 = smov 98  }
   0x9   :  { %s619_s27 = smov 94   ;;  %v492_v21 = vld [vmem:[%s894_s0 + $0x1f] sm:$0x1]   ;;  %v491_v22 = vld [vmem:[%s894_s0 + $0xd] sm:$0x1]   ;;  %s620_s3 = smov 89  }
   0xa   :  { %v493_v23 = vld [vmem:[%s894_s0 + $0x31] sm:$0x1]   ;;  %s621_s6 = smov 91   ;;  %s622_s7 = smov 87   ;;  %v495_v24 = vld [vmem:[%s894_s0 + $0x1e] sm:$0x1]  }
   0xb   :  { %v494_v25 = vld [vmem:[%s894_s0 + $0xc] sm:$0x1]   ;;  %s623_s12 = smov 82   ;;  %v496_v26 = vld [vmem:[%s894_s0 + $0x30] sm:$0x1]   ;;  %s624_s15 = smov 84  }
   0xc   :  { %48 = vrot.lane.b32.xlu1 %v479_v9, %s608_s25  ;;  %24 = vrot.lane.b32.xlu0 %v23_v10, %s609_s28  ;;  %s625_s16 = smov 80   ;;  %v498_v27 = vld [vmem:[%s894_s0 + $0x1d] sm:$0x1]   ;;  %v497_v28 = vld [vmem:[%s894_s0 + $0xb] sm:$0x1]   ;;  %s626_s21 = smov 75  }
   0xd   :  { %61 = vrot.lane.b32.xlu2 %v481_v11, %s610_s29  ;;  %v499_v29 = vld [vmem:[%s894_s0 + $0x2f] sm:$0x1]   ;;  %s627_s24 = smov 77   ;;  %s628_s25 = smov 73   ;;  %v501_v30 = vld [vmem:[%s894_s0 + $0x1c] sm:$0x1]  }
   0xe   :  { %v500_v31 = vld [vmem:[%s894_s0 + $0xa] sm:$0x1]   ;;  %s629_s30 = smov 68   ;;  %v502_v32 = vld [vmem:[%s894_s0 + $0x2e] sm:$0x1]   ;;  %s630_s4 = smov 70  }
   0xf   :  { %v504_v33 = vld [vmem:[%s894_s0 + $0x1b] sm:$0x1]   ;;  %v503_v34 = vld [vmem:[%s894_s0 + $0x9] sm:$0x1]   ;;  %s632_s10 = smov 61   ;;  %s633_s13 = smov 63  }
  0x10   :  { %v505_v35 = vld [vmem:[%s894_s0 + $0x2d] sm:$0x1]   ;;  %v507_v36 = vld [vmem:[%s894_s0 + $0x8] sm:$0x1]   ;;  %v506_v37 = vld [vmem:[%s894_s0 + $0x3f] sm:$0x1]  }
  0x11   :  { %s635_s19 = smov 56   ;;  %v508_v38 = vld [vmem:[%s894_s0 + $0x1a] sm:$0x1]   ;;  %s636_s22 = smov 57   ;;  %v2_v39 = vld [vmem:[%s894_s0] sm:$0x1]  }
  0x12   :  { %4 = vst.msk [vmem:[#allocation0] sm:$0x1] %vm3_vm3, %v2_v39   ;;  %v510_v40 = vld [vmem:[%s894_s0 + $0x3e] sm:$0x1]   ;;  %v509_v41 = vld [vmem:[%s894_s0 + $0x2c] sm:$0x1]  }
  0x13   :  { %v511_v42 = vld [vmem:[%s894_s0 + $0x7] sm:$0x1]   ;;  %v513_v43 = vld [vmem:[%s894_s0 + $0x2b] sm:$0x1]   ;;  %v512_v45 = vld [vmem:[%s894_s0 + $0x19] sm:$0x1]  }
  0x14   :  { %74 = vrot.lane.b32.xlu1 %v483_v12, %s611_s5  ;;  %68 = vrot.lane.b32.xlu0 %v482_v13, %s612_s8  ;;  %s631_s5 = smov 66   ;;  %v514_v46 = vld [vmem:[%s894_s0 + $0x3d] sm:$0x1]   ;;  %v516_v47 = vld [vmem:[%s894_s0 + $0x18] sm:$0x1]   ;;  %s647_s28 = smov 35  }
  0x15   :  { %81 = vrot.lane.b32.xlu2 %v484_v14, %s613_s9  ;;  %v515_v49 = vld [vmem:[%s894_s0 + $0x6] sm:$0x1]   ;;  %v517_v50 = vld [vmem:[%s894_s0 + $0x2a] sm:$0x1]   ;;  %v519_v51 = vld [vmem:[%s894_s0 + $0x5] sm:$0x1]  }
  0x16   :  { %v518_v53 = vld [vmem:[%s894_s0 + $0x3c] sm:$0x1]   ;;  %vm40_vm4 = vcmask 7168   ;;  %v520_v54 = vld [vmem:[%s894_s0 + $0x17] sm:$0x1]   ;;  %s648_s2 = smov 36  }
  0x17   :  { %vm13_vm5 = vcmask 39936   ;;  %vm16_vm6 = vcmask 1048560   ;;  %v522_v57 = vld [vmem:[%s894_s0 + $0x3b] sm:$0x1]   ;;  %v521_v59 = vld [vmem:[%s894_s0 + $0x29] sm:$0x1]  }
  0x18   :  { %s650_s8 = smov 29   ;;  %vm50_vm7 = vcmask 1032120   ;;  %v523_v60 = vld [vmem:[%s894_s0 + $0x4] sm:$0x1]   ;;  %s651_s11 = smov 31   ;;  %vm26_vm8 = vcmask 23552  }
  0x19   :  { %vm29_vm9 = vcmask 1048544   ;;  %vm43_vm10 = vcmask 1048528   ;;  %vm56_vm11 = vcmask 1015720   ;;  %vm63_vm12 = vcmask 999320   ;;  %v525_v63 = vld [vmem:[%s894_s0 + $0x28] sm:$0x1]  }
  0x1a   :  { %v524_v1 = vld [vmem:[%s894_s0 + $0x16] sm:$0x1]   ;;  %vm83_vm13 = vcmask 941920   ;;  %vm103_vm14 = vcmask 884520   ;;  %vm76_vm15 = vcmask 958320   ;;  %s654_s20 = smov 26  }
  0x1b   :  { %v526_v2 = vld [vmem:[%s894_s0 + $0x3a] sm:$0x1]   ;;  %vm70_vm0 = vcmask 974720   ;;  %vm123_vm1 = vcmask 827120   ;;  %vm143_vm2 = vcmask 769720   ;;  %vm96_vm3 = vcmask 900920  }
  0x1c   :  { %94 = vrot.lane.b32.xlu1 %v486_v15, %s614_s14  ;;  %88 = vrot.lane.b32.xlu0 %v485_v16, %s615_s17  ;;  %s634_s14 = smov 59   ;;  %s653_s17 = smov 24   ;;  %v528_v5 = vld [vmem:[%s894_s0 + $0x15] sm:$0x1]   ;;  %v527_v7 = vld [vmem:[%s894_s0 + $0x3] sm:$0x1]  }
  0x1d   :  { %101 = vrot.lane.b32.xlu2 %v487_v17, %s616_s18  ;;  %v529_v8 = vld [vmem:[%s894_s0 + $0x27] sm:$0x1]   ;;  %s657_s29 = smov 21   ;;  %v531_v11 = vld [vmem:[%s894_s0 + $0x2] sm:$0x1]   ;;  %s660_s9 = smov 15  }
  0x1e   :  { %v530_v13 = vld [vmem:[%s894_s0 + $0x39] sm:$0x1]   ;;  %v532_v14 = vld [vmem:[%s894_s0 + $0x14] sm:$0x1]   ;;  %v534_v17 = vld [vmem:[%s894_s0 + $0x38] sm:$0x1]  }
  0x1f   :  { %s663_s18 = smov 10  }
  0x24   :  { %114 = vrot.lane.b32.xlu1 %v489_v18, %s617_s23  ;;  %108 = vrot.lane.b32.xlu0 %v488_v19, %s618_s26  ;;  %s646_s23 = smov 38   ;;  %s656_s26 = smov 19   ;;  %v533_v19 = vld [vmem:[%s894_s0 + $0x26] sm:$0x1]  }
  0x25   :  { %121 = vrot.lane.b32.xlu2 %v490_v20, %s619_s27  ;;  %v535_v20 = vld [vmem:[%s894_s0 + $0x1] sm:$0x1]   ;;  %s667_s27 = smov 1  }
  0x2c   :  { %134 = vrot.lane.b32.xlu1 %v492_v21, %s620_s3  ;;  %128 = vrot.lane.b32.xlu0 %v491_v22, %s621_s6  ;;  %s649_s3 = smov 33   ;;  %s659_s6 = smov 14  }
  0x2d   :  { %141 = vrot.lane.b32.xlu2 %v493_v23, %s622_s7  ;;  %v537_v23 = vld [vmem:[%s894_s0 + $0x25] sm:$0x1]  }
  0x34   :  { %154 = vrot.lane.b32.xlu1 %v495_v24, %s623_s12  ;;  %148 = vrot.lane.b32.xlu0 %v494_v25, %s624_s15  ;;  %s652_s12 = smov 28   ;;  %s662_s15 = smov 8   ;;  %v536_v25 = vld [vmem:[%s894_s0 + $0x13] sm:$0x1]  }
  0x35   :  { %161 = vrot.lane.b32.xlu2 %v496_v26, %s625_s16  ;;  %v538_v26 = vld [vmem:[%s894_s0 + $0x37] sm:$0x1]   ;;  %s666_s0 = smov 5  }
  0x3c   :  { %174 = vrot.lane.b32.xlu1 %v498_v27, %s626_s21  ;;  %168 = vrot.lane.b32.xlu0 %v497_v28, %s627_s24  ;;  %s655_s21 = smov 22   ;;  %s665_s24 = smov 3  }
  0x3d   :  { %181 = vrot.lane.b32.xlu2 %v499_v29, %s628_s25  ;;  %s637_s25 = smov 54  }
  0x44   :  { %194 = vrot.lane.b32.xlu1 %v501_v30, %s629_s30  ;;  %188 = vrot.lane.b32.xlu0 %v500_v31, %s630_s4  ;;  %s638_s30 = smov 50   ;;  %s639_s4 = smov 52  }
  0x45   :  { %201 = vrot.lane.b32.xlu2 %v502_v32, %s631_s5  ;;  %s640_s5 = smov 49  }
  0x4c   :  { %214 = vrot.lane.b32.xlu1 %v504_v33, %s632_s10  ;;  %208 = vrot.lane.b32.xlu0 %v503_v34, %s633_s13  ;;  %s641_s10 = smov 45   ;;  %s642_s13 = smov 47  }
  0x4d   :  { %221 = vrot.lane.b32.xlu2 %v505_v35, %s634_s14  ;;  %s643_s14 = smov 43  }
  0x54   :  { %235 = vrot.lane.b32.xlu1 %v507_v36, %s635_s19  ;;  %228 = vrot.lane.b32.xlu0 %v506_v37, %s636_s22  ;;  %s644_s19 = smov 40   ;;  %s645_s22 = smov 42  }
  0x55   :  { %241 = vrot.lane.b32.xlu2 %v508_v38, %s637_s25 }
  0x5c   :  { %255 = vrot.lane.b32.xlu1 %v510_v40, %s638_s30  ;;  %248 = vrot.lane.b32.xlu0 %v509_v41, %s639_s4  ;;  %s658_s30 = smov 17  }
  0x5d   :  { %262 = vrot.lane.b32.xlu2 %v511_v42, %s640_s5 }
  0x5f   :  { %v801_v44 = vpop.permute.xlu2 %54  }
  0x64   :  { %275 = vrot.lane.b32.xlu1 %v513_v43, %s641_s10  ;;  %268 = vrot.lane.b32.xlu0 %v512_v45, %s642_s13  ;;  %s661_s10 = smov 12  }
  0x65   :  { %282 = vrot.lane.b32.xlu2 %v514_v46, %s643_s14 }
  0x67   :  { %v62_v48 = vpop.permute.xlu2 %61  }
  0x6c   :  { %295 = vrot.lane.b32.xlu1 %v516_v47, %s644_s19  ;;  %289 = vrot.lane.b32.xlu0 %v515_v49, %s645_s22  ;;  %s664_s19 = smov 7  }
  0x6d   :  { %302 = vrot.lane.b32.xlu2 %v517_v50, %s646_s23 }
  0x6f   :  { %v82_v52 = vpop.permute.xlu2 %81  }
  0x74   :  { %316 = vrot.lane.b32.xlu1 %v519_v51, %s647_s28  ;;  %309 = vrot.lane.b32.xlu0 %v518_v53, %s648_s2 }
  0x75   :  { %322 = vrot.lane.b32.xlu2 %v520_v54, %s649_s3 }
  0x76   :  { %v39_v55 = vpop.permute.xlu1 %38   ;;  %v12_v56 = vpop.permute.xlu0 %11  }
  0x77   :  { %42 = vst.msk [vmem:[#allocation0 + $0x18] sm:$0x1] %vm40_vm4, %v39_v55   ;;  %v102_v58 = vpop.permute.xlu2 %101   ;;  %vm90_vm4 = vcmask 917320  }
  0x78   :  { %15 = vst.msk [vmem:[#allocation0 + $0x8] sm:$0x1] %vm13_vm5, %v12_v56   ;;  %vm163_vm5 = vcmask 712320  }
  0x79   :  { %17 = vst.msk [vmem:[#allocation0] sm:$0x1] %vm16_vm6, %v12_v56   ;;  %vm116_vm6 = vcmask 843520  }
  0x7c   :  { %336 = vrot.lane.b32.xlu1 %v522_v57, %s650_s8  ;;  %329 = vrot.lane.b32.xlu0 %v521_v59, %s651_s11 }
  0x7d   :  { %343 = vrot.lane.b32.xlu2 %v523_v60, %s652_s12 }
  0x7e   :  { %v49_v61 = vpop.permute.xlu1 %48   ;;  %v25_v62 = vpop.permute.xlu0 %24  }
  0x7f   :  { %51 = vst.msk [vmem:[#allocation0] sm:$0x1] %vm50_vm7, %v49_v61   ;;  %v122_v0 = vpop.permute.xlu2 %121   ;;  %vm110_vm7 = vcmask 859920  }
  0x80   :  { %28 = vst.msk [vmem:[#allocation0 + $0x10] sm:$0x1] %vm26_vm8, %v25_v62   ;;  %vm183_vm8 = vcmask 654920  }
  0x81   :  { %31 = vst.msk [vmem:[#allocation0 + $0x8] sm:$0x1] %vm29_vm9, %v25_v62   ;;  %vm136_vm9 = vcmask 786120  }
  0x82   :  { %45 = vst.msk [vmem:[#allocation0 + $0x10] sm:$0x1] %vm43_vm10, %v39_v55   ;;  %vm130_vm10 = vcmask 802520  }
  0x83   :  { %58 = vst.msk [vmem:[#allocation0 + $0x8] sm:$0x1] %vm56_vm11, %v801_v44   ;;  %vm203_vm11 = vcmask 597520  }
  0x84   :  { %65 = vst.msk [vmem:[#allocation0 + $0x10] sm:$0x1] %vm63_vm12, %v62_v48   ;;  %356 = vrot.lane.b32.xlu1 %v525_v63, %s653_s17  ;;  %349 = vrot.lane.b32.xlu0 %v524_v1, %s654_s20  ;;  %vm156_vm12 = vcmask 728720  }
  0x85   :  { %85 = vst.msk [vmem:[#allocation0 + $0x10] sm:$0x1] %vm83_vm13, %v82_v52   ;;  %363 = vrot.lane.b32.xlu2 %v526_v2, %s655_s21  ;;  %vm150_vm13 = vcmask 745120  }
  0x86   :  { %v75_v3 = vpop.permute.xlu1 %74   ;;  %105 = vst.msk [vmem:[#allocation0 + $0x10] sm:$0x1] %vm103_vm14, %v102_v58   ;;  %v69_v4 = vpop.permute.xlu0 %68   ;;  %vm223_vm14 = vcmask 540120  }
  0x87   :  { %78 = vst.msk [vmem:[#allocation0 + $0x8] sm:$0x1] %vm76_vm15, %v75_v3   ;;  %v142_v6 = vpop.permute.xlu2 %141   ;;  %vm176_vm15 = vcmask 671320  }
  0x88   :  { %71 = vst.msk [vmem:[#allocation0] sm:$0x1] %vm70_vm0, %v69_v4   ;;  %vm170_vm0 = vcmask 687720  }
  0x89   :  { %125 = vst.msk [vmem:[#allocation0 + $0x10] sm:$0x1] %vm123_vm1, %v122_v0   ;;  %vm196_vm1 = vcmask 613920  }
  0x8a   :  { %145 = vst.msk [vmem:[#allocation0 + $0x10] sm:$0x1] %vm143_vm2, %v142_v6   ;;  %vm190_vm2 = vcmask 630320  }
  0x8c   :  { %376 = vrot.lane.b32.xlu1 %v528_v5, %s656_s26  ;;  %370 = vrot.lane.b32.xlu0 %v527_v7, %s657_s29 }
  0x8d   :  { %383 = vrot.lane.b32.xlu2 %v529_v8, %s658_s30 }
  0x8e   :  { %v95_v9 = vpop.permute.xlu1 %94   ;;  %v89_v10 = vpop.permute.xlu0 %88  }
  0x8f   :  { %98 = vst.msk [vmem:[#allocation0 + $0x8] sm:$0x1] %vm96_vm3, %v95_v9   ;;  %v162_v12 = vpop.permute.xlu2 %161   ;;  %vm216_vm3 = vcmask 556520  }
  0x90   :  { %91 = vst.msk [vmem:[#allocation0] sm:$0x1] %vm90_vm4, %v89_v10   ;;  %vm210_vm4 = vcmask 572920  }
  0x91   :  { %165 = vst.msk [vmem:[#allocation0 + $0x10] sm:$0x1] %vm163_vm5, %v162_v12   ;;  %vm243_vm5 = vcmask 499120  }
  0x94   :  { %397 = vrot.lane.b32.xlu1 %v531_v11, %s659_s6  ;;  %390 = vrot.lane.b32.xlu0 %v530_v13, %s660_s9 }
  0x95   :  { %403 = vrot.lane.b32.xlu2 %v532_v14, %s661_s10 }
  0x96   :  { %v115_v15 = vpop.permute.xlu1 %114   ;;  %v109_v16 = vpop.permute.xlu0 %108  }
  0x97   :  { %118 = vst.msk [vmem:[#allocation0 + $0x8] sm:$0x1] %vm116_vm6, %v115_v15   ;;  %v182_v18 = vpop.permute.xlu2 %181   ;;  %vm237_vm6 = vcmask 515520  }
  0x98   :  { %111 = vst.msk [vmem:[#allocation0] sm:$0x1] %vm110_vm7, %v109_v16   ;;  %vm230_vm7 = vcmask 523720  }
  0x99   :  { %185 = vst.msk [vmem:[#allocation0 + $0x10] sm:$0x1] %vm183_vm8, %v182_v18   ;;  %vm264_vm8 = vcmask 458120  }
  0x9c   :  { %417 = vrot.lane.b32.xlu1 %v534_v17, %s662_s15  ;;  %410 = vrot.lane.b32.xlu0 %v533_v19, %s663_s18 }
  0x9d   :  { %424 = vrot.lane.b32.xlu2 %v535_v20, %s664_s19 }
  0x9e   :  { %v135_v21 = vpop.permute.xlu1 %134   ;;  %v129_v22 = vpop.permute.xlu0 %128  }
  0x9f   :  { %138 = vst.msk [vmem:[#allocation0 + $0x8] sm:$0x1] %vm136_vm9, %v135_v21   ;;  %v202_v24 = vpop.permute.xlu2 %201   ;;  %vm257_vm9 = vcmask 466320  }
  0xa0   :  { %131 = vst.msk [vmem:[#allocation0] sm:$0x1] %vm130_vm10, %v129_v22   ;;  %vm250_vm10 = vcmask 482720  }
  0xa1   :  { %205 = vst.msk [vmem:[#allocation0 + $0x10] sm:$0x1] %vm203_vm11, %v202_v24   ;;  %vm284_vm11 = vcmask 408920  }
  0xa4   :  { %437 = vrot.lane.b32.xlu1 %v537_v23, %s665_s24  ;;  %430 = vrot.lane.b32.xlu0 %v536_v25, %s666_s0 }
  0xa5   :  { %444 = vrot.lane.b32.xlu2 %v538_v26, %s667_s27 }
  0xa6   :  { %v155_v27 = vpop.permute.xlu1 %154   ;;  %v149_v28 = vpop.permute.xlu0 %148  }
  0xa7   :  { %158 = vst.msk [vmem:[#allocation0 + $0x8] sm:$0x1] %vm156_vm12, %v155_v27   ;;  %v222_v29 = vpop.permute.xlu2 %221   ;;  %vm277_vm12 = vcmask 425320  }
  0xa8   :  { %151 = vst.msk [vmem:[#allocation0] sm:$0x1] %vm150_vm13, %v149_v28   ;;  %vm270_vm13 = vcmask 441720  }
  0xa9   :  { %225 = vst.msk [vmem:[#allocation0 + $0x10] sm:$0x1] %vm223_vm14, %v222_v29   ;;  %vm304_vm14 = vcmask 367920  }
  0xae   :  { %v175_v30 = vpop.permute.xlu1 %174   ;;  %v169_v31 = vpop.permute.xlu0 %168  }
  0xaf   :  { %178 = vst.msk [vmem:[#allocation0 + $0x8] sm:$0x1] %vm176_vm15, %v175_v30   ;;  %v242_v32 = vpop.permute.xlu2 %241   ;;  %vm297_vm15 = vcmask 384320  }
  0xb0   :  { %171 = vst.msk [vmem:[#allocation0] sm:$0x1] %vm170_vm0, %v169_v31   ;;  %vm291_vm0 = vcmask 400720  }
  0xb6   :  { %v195_v33 = vpop.permute.xlu1 %194   ;;  %v189_v34 = vpop.permute.xlu0 %188  }
  0xb7   :  { %198 = vst.msk [vmem:[#allocation0 + $0x8] sm:$0x1] %vm196_vm1, %v195_v33   ;;  %v263_v35 = vpop.permute.xlu2 %262   ;;  %vm324_vm1 = vcmask 326920  }
  0xb8   :  { %191 = vst.msk [vmem:[#allocation0] sm:$0x1] %vm190_vm2, %v189_v34   ;;  %vm318_vm2 = vcmask 343320  }
  0xbe   :  { %v215_v36 = vpop.permute.xlu1 %214   ;;  %v209_v37 = vpop.permute.xlu0 %208  }
  0xbf   :  { %218 = vst.msk [vmem:[#allocation0 + $0x8] sm:$0x1] %vm216_vm3, %v215_v36   ;;  %v283_v38 = vpop.permute.xlu2 %282   ;;  %vm311_vm3 = vcmask 351520  }
  0xc0   :  { %211 = vst.msk [vmem:[#allocation0] sm:$0x1] %vm210_vm4, %v209_v37   ;;  %vm345_vm4 = vcmask 285920  }
  0xc1   :  { %245 = vst.msk [vmem:[#allocation0 + $0x8] sm:$0x1] %vm243_vm5, %v242_v32   ;;  %vm338_vm5 = vcmask 294120  }
  0xc6   :  { %v236_v39 = vpop.permute.xlu1 %235   ;;  %v229_v40 = vpop.permute.xlu0 %228  }
  0xc7   :  { %238 = vst.msk [vmem:[#allocation0] sm:$0x1] %vm237_vm6, %v236_v39   ;;  %v303_v41 = vpop.permute.xlu2 %302   ;;  %vm331_vm6 = vcmask 310520  }
  0xc8   :  { %232 = vst.msk [vmem:[#allocation0 + $0x18] sm:$0x1] %vm230_vm7, %v229_v40   ;;  %vm365_vm7 = vcmask 236720  }
  0xc9   :  { %265 = vst.msk [vmem:[#allocation0] sm:$0x1] %vm264_vm8, %v263_v35   ;;  %vm358_vm8 = vcmask 253120  }
  0xce   :  { %v256_v42 = vpop.permute.xlu1 %255   ;;  %v249_v43 = vpop.permute.xlu0 %248  }
  0xcf   :  { %259 = vst.msk [vmem:[#allocation0 + $0x18] sm:$0x1] %vm257_vm9, %v256_v42   ;;  %v323_v44 = vpop.permute.xlu2 %322   ;;  %vm351_vm9 = vcmask 269520  }
  0xd0   :  { %252 = vst.msk [vmem:[#allocation0 + $0x10] sm:$0x1] %vm250_vm10, %v249_v43   ;;  %vm385_vm10 = vcmask 195720  }
  0xd1   :  { %286 = vst.msk [vmem:[#allocation0 + $0x18] sm:$0x1] %vm284_vm11, %v283_v38   ;;  %vm378_vm11 = vcmask 212120  }
  0xd6   :  { %v276_v45 = vpop.permute.xlu1 %275   ;;  %v269_v46 = vpop.permute.xlu0 %268  }
  0xd7   :  { %279 = vst.msk [vmem:[#allocation0 + $0x10] sm:$0x1] %vm277_vm12, %v276_v45   ;;  %v344_v47 = vpop.permute.xlu2 %343   ;;  %vm372_vm12 = vcmask 228520  }
  0xd8   :  { %272 = vst.msk [vmem:[#allocation0 + $0x8] sm:$0x1] %vm270_vm13, %v269_v46   ;;  %vm405_vm13 = vcmask 154720  }
  0xd9   :  { %306 = vst.msk [vmem:[#allocation0 + $0x10] sm:$0x1] %vm304_vm14, %v303_v41   ;;  %vm399_vm14 = vcmask 171120  }
  0xde   :  { %v296_v48 = vpop.permute.xlu1 %295   ;;  %v290_v49 = vpop.permute.xlu0 %289  }
  0xdf   :  { %299 = vst.msk [vmem:[#allocation0 + $0x8] sm:$0x1] %vm297_vm15, %v296_v48   ;;  %v364_v50 = vpop.permute.xlu2 %363   ;;  %vm392_vm15 = vcmask 179320  }
  0xe0   :  { %292 = vst.msk [vmem:[#allocation0] sm:$0x1] %vm291_vm0, %v290_v49   ;;  %vm426_vm0 = vcmask 113720  }
  0xe1   :  { %326 = vst.msk [vmem:[#allocation0 + $0x8] sm:$0x1] %vm324_vm1, %v323_v44   ;;  %vm419_vm1 = vcmask 121920  }
  0xe6   :  { %v317_v51 = vpop.permute.xlu1 %316   ;;  %v310_v52 = vpop.permute.xlu0 %309  }
  0xe7   :  { %319 = vst.msk [vmem:[#allocation0] sm:$0x1] %vm318_vm2, %v317_v51   ;;  %v384_v53 = vpop.permute.xlu2 %383   ;;  %vm412_vm2 = vcmask 138320  }
  0xe8   :  { %313 = vst.msk [vmem:[#allocation0 + $0x18] sm:$0x1] %vm311_vm3, %v310_v52   ;;  %vm446_vm3 = vcmask 64520  }
  0xe9   :  { %346 = vst.msk [vmem:[#allocation0] sm:$0x1] %vm345_vm4, %v344_v47   ;;  %vm439_vm4 = vcmask 80920  }
  0xee   :  { %v337_v54 = vpop.permute.xlu1 %336   ;;  %v330_v55 = vpop.permute.xlu0 %329  }
  0xef   :  { %340 = vst.msk [vmem:[#allocation0 + $0x18] sm:$0x1] %vm338_vm5, %v337_v54   ;;  %v404_v56 = vpop.permute.xlu2 %403   ;;  %vm432_vm5 = vcmask 97320  }
  0xf0   :  { %333 = vst.msk [vmem:[#allocation0 + $0x10] sm:$0x1] %vm331_vm6, %v330_v55  }
  0xf1   :  { %367 = vst.msk [vmem:[#allocation0 + $0x18] sm:$0x1] %vm365_vm7, %v364_v50  }
  0xf6   :  { %v357_v57 = vpop.permute.xlu1 %356   ;;  %v350_v58 = vpop.permute.xlu0 %349  }
  0xf7   :  { %360 = vst.msk [vmem:[#allocation0 + $0x10] sm:$0x1] %vm358_vm8, %v357_v57   ;;  %v425_v59 = vpop.permute.xlu2 %424  }
  0xf8   :  { %353 = vst.msk [vmem:[#allocation0 + $0x8] sm:$0x1] %vm351_vm9, %v350_v58  }
  0xf9   :  { %387 = vst.msk [vmem:[#allocation0 + $0x10] sm:$0x1] %vm385_vm10, %v384_v53  }
  0xfe   :  { %v377_v60 = vpop.permute.xlu1 %376   ;;  %v371_v61 = vpop.permute.xlu0 %370  }
  0xff   :  { %380 = vst.msk [vmem:[#allocation0 + $0x8] sm:$0x1] %vm378_vm11, %v377_v60   ;;  %v445_v62 = vpop.permute.xlu2 %444  }
 0x100   :  { %373 = vst.msk [vmem:[#allocation0] sm:$0x1] %vm372_vm12, %v371_v61  }
 0x101   :  { %407 = vst.msk [vmem:[#allocation0 + $0x8] sm:$0x1] %vm405_vm13, %v404_v56  }
 0x106   :  { %v398_v63 = vpop.permute.xlu1 %397   ;;  %v391_v0 = vpop.permute.xlu0 %390  }
 0x107   :  { %400 = vst.msk [vmem:[#allocation0] sm:$0x1] %vm399_vm14, %v398_v63  }
 0x108   :  { %394 = vst.msk [vmem:[#allocation0 + $0x18] sm:$0x1] %vm392_vm15, %v391_v0  }
 0x109   :  { %427 = vst.msk [vmem:[#allocation0] sm:$0x1] %vm426_vm0, %v425_v59  }
 0x10e   :  { %v418_v1 = vpop.permute.xlu1 %417   ;;  %v411_v2 = vpop.permute.xlu0 %410  }
 0x10f   :  { %421 = vst.msk [vmem:[#allocation0 + $0x18] sm:$0x1] %vm419_vm1, %v418_v1  }
 0x110   :  { %v451_v3 = vld [vmem:[#allocation0] sm:$0x1]  ;;  %414 = vst.msk [vmem:[#allocation0 + $0x10] sm:$0x1] %vm412_vm2, %v411_v2  }
 0x111   :  { %454 = vst [vmem:[%s895_s1] sm:$0x1] %v451_v3 }
 0x112   :  { %448 = vst.msk [vmem:[#allocation0 + $0x18] sm:$0x1] %vm446_vm3, %v445_v62  }
 0x116   :  { %v438_v4 = vpop.permute.xlu1 %437   ;;  %v431_v5 = vpop.permute.xlu0 %430  }
 0x117   :  { %441 = vst.msk [vmem:[#allocation0 + $0x10] sm:$0x1] %vm439_vm4, %v438_v4  }
 0x118   :  { %434 = vst.msk [vmem:[#allocation0 + $0x8] sm:$0x1] %vm432_vm5, %v431_v5  }
 0x119   :  { %v468_v6 = vld [vmem:[#allocation0 + $0x18] sm:$0x1] }
 0x11a   :  { %541 = vst [vmem:[%s895_s1 + $0x3] sm:$0x1] %v468_v6 }
 0x11e   :  { %v462_v7 = vld [vmem:[#allocation0 + $0x10] sm:$0x1] }
 0x11f   :  { %540 = vst [vmem:[%s895_s1 + $0x2] sm:$0x1] %v462_v7  ;;  %v456_v8 = vld [vmem:[#allocation0 + $0x8] sm:$0x1] }
 0x120   :  { %539 = vst [vmem:[%s895_s1 + $0x1] sm:$0x1] %v456_v8 }

// kernel: weighted_l1_loss.1
= control target key start
LH: loop header
LB: loop body
LE: loop exit
PB: predicated region body
PF: predicated region fallthrough
CT: control target
= control target key end

     0   :  { %vm80_vm0 = vcmask 523264   ;;  %vm38_vm2 = vcmask 1043456   ;;  %vm1045_vm4 = vcmask 1042432   ;;  %vm1046_vm5 = vcmask 522244   ;;  %s1716_s4 = inlined_call_operand.vmem [shape: f32[64,448], index: 4, kind: input, shape index: {}]   ;;  %s1717_s3 = inlined_call_operand.vmem [shape: f32[3,64], index: 3, kind: input, shape index: {}]   ;;  %s1718_s2 = inlined_call_operand.vmem [shape: f32[1,448], index: 2, kind: input, shape index: {}]   ;;  %s1719_s1 = inlined_call_operand.vmem [shape: f32[3,448], index: 1, kind: input, shape index: {}]   ;;  %s1720_s0 = inlined_call_operand.vmem [shape: f32[3,448], index: 0, kind: input, shape index: {}]   ;;  %s1721_s5 = inlined_call_operand.vmem [shape: f32[3,448], index: 5, kind: output, shape index: {}]  }
   0x1   :  { %v76_v0 = vld [vmem:[%s1716_s4 + $0xe0] sm:$0xff]  ;;  %v77_v22 = vld [vmem:[%s1716_s4 + $0xe8] sm:$0xff]  ;;  %vm1047_vm6 = vmor %vm1046_vm5, %vm1045_vm4 }
   0x2   :  { %v72_v1 = vld [vmem:[%s1716_s4 + $0xc0] sm:$0xff]  ;;  %v1092_v3 = vand.u32 4294901760, %v76_v0  ;;  %v73_v30 = vld [vmem:[%s1716_s4 + $0xc8] sm:$0xff]  ;;  %v1172_v34 = vand.u32 4294901760, %v77_v22 }
   0x3   :  { %v68_v2 = vld [vmem:[%s1716_s4 + $0xa0] sm:$0xff]  ;;  %v1094_v4 = vand.u32 4294901760, %v72_v1  ;;  %v69_v37 = vld [vmem:[%s1716_s4 + $0xa8] sm:$0xff]  ;;  %v1190_v42 = vand.u32 4294901760, %v73_v30 }
   0x4   :  { %v1096_v5 = vand.u32 4294901760, %v68_v2  ;;  %v64_v6 = vld [vmem:[%s1716_s4 + $0x80] sm:$0xff]  ;;  %93 = vmatpush.msra.mxu0 %v1092_v3  ;;  %v1121_v14 = vsub.f32 %v76_v0, %v1092_v3  ;;  %225 = vmatpush.msra.mxu3 %v1092_v3  ;;  %v65_v38 = vld [vmem:[%s1716_s4 + $0x88] sm:$0xff]  ;;  %v1207_v49 = vsub.f32 %v77_v22, %v1172_v34  ;;  %v1209_v50 = vand.u32 4294901760, %v69_v37 }
   0x5   :  { %v60_v7 = vld [vmem:[%s1716_s4 + $0x60] sm:$0xff]  ;;  %v1107_v9 = vand.u32 4294901760, %v64_v6  ;;  %v1124_v15 = vsub.f32 %v72_v1, %v1094_v4  ;;  %v61_v43 = vld [vmem:[%s1716_s4 + $0x68] sm:$0xff]  ;;  %v1212_v51 = vsub.f32 %v73_v30, %v1190_v42  ;;  %v1217_v53 = vand.u32 4294901760, %v65_v38 }
   0x6   :  { %v56_v8 = vld [vmem:[%s1716_s4 + $0x40] sm:$0xff]  ;;  %v1109_v10 = vand.u32 4294901760, %v60_v7  ;;  %v1128_v16 = vsub.f32 %v68_v2, %v1096_v5  ;;  %188 = vmatpush.msra.mxu2 %v1121_v14  ;;  %95 = vmatpush.msra.mxu0 %v1094_v4  ;;  %v127_v23 = vand.u32 4294901760, %v1121_v14  ;;  %v57_v44 = vld [vmem:[%s1716_s4 + $0x48] sm:$0xff]  ;;  %v1219_v54 = vand.u32 4294901760, %v61_v43 }
   0x7   :  { %v1111_v11 = vand.u32 4294901760, %v56_v8  ;;  %v52_v12 = vld [vmem:[%s1716_s4 + $0x20] sm:$0xff]  ;;  %v1133_v18 = vsub.f32 %v64_v6, %v1107_v9  ;;  %v133_v24 = vand.u32 4294901760, %v1124_v15  ;;  %227 = vmatpush.msra.mxu3 %v1094_v4  ;;  %v1221_v55 = vand.u32 4294901760, %v57_v44  ;;  %v53_v56 = vld [vmem:[%s1716_s4 + $0x28] sm:$0xff] }
   0x8   :  { %v48_v13 = vld [vmem:[%s1716_s4] sm:$0xff]  ;;  %v1130_v17 = vand.u32 4294901760, %v52_v12  ;;  %v1136_v19 = vsub.f32 %v60_v7, %v1109_v10  ;;  %v139_v25 = vand.u32 4294901760, %v1128_v16  ;;  %191 = vmatpush.msra.mxu2 %v1124_v15  ;;  %97 = vmatpush.msra.mxu0 %v1096_v5  ;;  %v128_v31 = vsub.f32 %v1121_v14, %v127_v23 }
   0x9   :  { %v1139_v20 = vsub.f32 %v56_v8, %v1111_v11  ;;  %v1141_v21 = vand.u32 4294901760, %v48_v13  ;;  %v145_v27 = vand.u32 4294901760, %v1133_v18  ;;  %v134_v32 = vsub.f32 %v1124_v15, %v133_v24  ;;  %229 = vmatpush.msra.mxu3 %v1096_v5  ;;  %v47_v61 = vld [vmem:[%s1717_s3] sm:$0x7] }
   0xa   :  { %v1152_v26 = vsub.f32 %v52_v12, %v1130_v17  ;;  %v151_v28 = vand.u32 4294901760, %v1136_v19  ;;  %v140_v33 = vsub.f32 %v1128_v16, %v139_v25  ;;  %v129_v39 = vand.u32 4294901760, %v128_v31  ;;  %194 = vmatpush.msra.mxu2 %v1128_v16  ;;  %99 = vmatpush.msra.mxu0 %v1107_v9  ;;  %v49_v31 = vld [vmem:[%s1716_s4 + $0x8] sm:$0xff] }
   0xb   :  { %v157_v29 = vand.u32 4294901760, %v1139_v20  ;;  %v146_v35 = vsub.f32 %v1133_v18, %v145_v27  ;;  %v1179_v36 = vsub.f32 %v48_v13, %v1141_v21  ;;  %v135_v40 = vand.u32 4294901760, %v134_v32  ;;  %231 = vmatpush.msra.mxu3 %v1107_v9 }
   0xc   :  { %v163_v41 = vand.u32 4294901760, %v1152_v26  ;;  %v141_v45 = vand.u32 4294901760, %v140_v33  ;;  %v152_v46 = vsub.f32 %v1136_v19, %v151_v28  ;;  %130 = vmatpush.msra.mxu1 %v129_v39  ;;  %197 = vmatpush.msra.mxu2 %v1133_v18  ;;  %v364_v58 = vand.u32 4294901760, %v1207_v49 }
   0xd   :  { %v158_v47 = vsub.f32 %v1139_v20, %v157_v29  ;;  %v147_v48 = vand.u32 4294901760, %v146_v35  ;;  %101 = vmatpush.msra.mxu0 %v1109_v10  ;;  %233 = vmatpush.msra.mxu3 %v1109_v10  ;;  %v169_v52 = vand.u32 4294901760, %v1179_v36  ;;  %v370_v59 = vand.u32 4294901760, %v1212_v51 }
   0xe   :  { %136 = vmatpush.msra.mxu1 %v135_v40  ;;  %200 = vmatpush.msra.mxu2 %v1136_v19  ;;  %v164_v57 = vsub.f32 %v1152_v26, %v163_v41  ;;  %v1233_v60 = vsub.f32 %v69_v37, %v1209_v50  ;;  %v153_v62 = vand.u32 4294901760, %v152_v46  ;;  %v1241_v63 = vsub.f32 %v65_v38, %v1217_v53 }
   0xf   :  { %103 = vmatpush.msra.mxu0 %v1111_v11  ;;  %235 = vmatpush.msra.mxu3 %v1111_v11  ;;  %v1244_v0 = vsub.f32 %v61_v43, %v1219_v54  ;;  %v1247_v1 = vsub.f32 %v57_v44, %v1221_v55  ;;  %v365_v2 = vsub.f32 %v1207_v49, %v364_v58  ;;  %v1257_v8 = vand.u32 4294901760, %v53_v56 }
  0x10   :  { %142 = vmatpush.msra.mxu1 %v141_v45  ;;  %203 = vmatpush.msra.mxu2 %v1139_v20  ;;  %v371_v6 = vsub.f32 %v1212_v51, %v370_v59  ;;  %v376_v7 = vand.u32 4294901760, %v1233_v60  ;;  %v159_v12 = vand.u32 4294901760, %v158_v47  ;;  %v170_v13 = vsub.f32 %v1179_v36, %v169_v52  ;;  %v66_v20 = vld [vmem:[%s1716_s4 + $0x90] sm:$0xff] }
  0x11   :  { %105 = vmatpush.msra.mxu0 %v1130_v17  ;;  %237 = vmatpush.msra.mxu3 %v1130_v17  ;;  %v382_v22 = vand.u32 4294901760, %v1241_v63  ;;  %v82_v30 = vsel %vm80_vm0, %v47_v61, 0  ;;  %v366_v32 = vand.u32 4294901760, %v365_v2  ;;  %v388_v35 = vand.u32 4294901760, %v1244_v0 }
  0x12   :  { %148 = vmatpush.msra.mxu1 %v147_v48  ;;  %206 = vmatpush.msra.mxu2 %v1152_v26  ;;  %v377_v33 = vsub.f32 %v1233_v60, %v376_v7  ;;  %v1274_v37 = vand.u32 4294901760, %v82_v30  ;;  %v165_v38 = vand.u32 4294901760, %v164_v57  ;;  %v394_v39 = vand.u32 4294901760, %v1247_v1 }
  0x13   :  { %107 = vmatpush.msra.mxu0 %v1141_v21  ;;  %239 = vmatpush.msra.mxu3 %v1141_v21  ;;  %v372_v40 = vand.u32 4294901760, %v371_v6  ;;  %v383_v43 = vsub.f32 %v1241_v63, %v382_v22  ;;  %v1283_v44 = vand.u32 4294901760, %v49_v31  ;;  %v1286_v45 = vsub.f32 %v53_v56, %v1257_v8 }
  0x14   :  { %154 = vmatpush.msra.mxu1 %v153_v62  ;;  %209 = vmatpush.msra.mxu2 %v1179_v36  ;;  %v1292_v46 = vsub.f32 %v82_v30, %v1274_v37  ;;  %v171_v47 = vand.u32 4294901760, %v170_v13  ;;  %v378_v48 = vand.u32 4294901760, %v377_v33  ;;  %v389_v57 = vsub.f32 %v1244_v0, %v388_v35  ;;  %v58_v36 = vld [vmem:[%s1716_s4 + $0x50] sm:$0xff] }
  0x15   :  { %258 = vmatpush.msrb.mxu0 %v127_v23  ;;  %367 = vmatpush.msrb.mxu3 %v366_v32  ;;  %v400_v61 = vand.u32 4294901760, %v1286_v45  ;;  %v384_v14 = vand.u32 4294901760, %v383_v43  ;;  %v395_v23 = vsub.f32 %v1247_v1, %v394_v39  ;;  %v1305_v56 = vsub.f32 %v49_v31, %v1283_v44 }
  0x16   :  { %330 = vmatpush.msrb.mxu2 %v1172_v34  ;;  %160 = vmatpush.msra.mxu1 %v159_v12  ;;  %v1311_v15 = vand.u32 4294901760, %v1292_v46 }
  0x17   :  { %262 = vmatpush.msrb.mxu0 %v133_v24  ;;  %373 = vmatpush.msrb.mxu3 %v372_v40  ;;  %v390_v24 = vand.u32 4294901760, %v389_v57  ;;  %v401_v62 = vsub.f32 %v1286_v45, %v400_v61  ;;  %v396_v16 = vand.u32 4294901760, %v395_v23 }
  0x18   :  { %332 = vmatpush.msrb.mxu2 %v1190_v42  ;;  %166 = vmatpush.msra.mxu1 %v165_v38  ;;  %v111_v2 = vsub.f32 %v1292_v46, %v1311_v15  ;;  %v67_v38 = vld [vmem:[%s1716_s4 + $0x98] sm:$0xff] }
  0x19   :  { %266 = vmatpush.msrb.mxu0 %v139_v25  ;;  %379 = vmatpush.msrb.mxu3 %v378_v48  ;;  %v406_v25 = vand.u32 4294901760, %v1305_v56  ;;  %v63_v48 = vld [vmem:[%s1716_s4 + $0x78] sm:$0xff] }
  0x1a   :  { %334 = vmatpush.msrb.mxu2 %v1209_v50  ;;  %172 = vmatpush.msra.mxu1 %v171_v47  ;;  %v1337_v18 = vand.u32 4294901760, %v111_v2  ;;  %v59_v2 = vld [vmem:[%s1716_s4 + $0x58] sm:$0xff] }
  0x1b   :  { %270 = vmatpush.msrb.mxu0 %v145_v27  ;;  %385 = vmatpush.msrb.mxu3 %v384_v14  ;;  %v1396_v27 = vand.u32 4294901760, %v66_v20  ;;  %v1520_v14 = vand.u32 4294901760, %v67_v38 }
  0x1c   :  { %301 = vmatpush.msrb.mxu1 %v1092_v3  ;;  %336 = vmatpush.msrb.mxu2 %v1217_v53  ;;  %v402_v3 = vand.u32 4294901760, %v401_v62 }
  0x1d   :  { %274 = vmatpush.msrb.mxu0 %v151_v28  ;;  %391 = vmatpush.msrb.mxu3 %v390_v24  ;;  %v62_v28 = vld [vmem:[%s1716_s4 + $0x70] sm:$0xff] }
  0x1e   :  { %303 = vmatpush.msrb.mxu1 %v1094_v4  ;;  %338 = vmatpush.msrb.mxu2 %v1219_v54  ;;  %v407_v4 = vsub.f32 %v1305_v56, %v406_v25 }
  0x1f   :  { %278 = vmatpush.msrb.mxu0 %v157_v29  ;;  %397 = vmatpush.msrb.mxu3 %v396_v16 }
  0x20   :  { %305 = vmatpush.msrb.mxu1 %v1096_v5  ;;  %340 = vmatpush.msrb.mxu2 %v1221_v55  ;;  %v408_v5 = vand.u32 4294901760, %v407_v4 }
  0x21   :  { %282 = vmatpush.msrb.mxu0 %v163_v41  ;;  %403 = vmatpush.msrb.mxu3 %v402_v3 }
  0x22   :  { %307 = vmatpush.msrb.mxu1 %v1107_v9  ;;  %342 = vmatpush.msrb.mxu2 %v1257_v8  ;;  %v78_v9 = vld [vmem:[%s1716_s4 + $0xf0] sm:$0xff] }
  0x23   :  { %212 = vmatmul.f32.vlgmr.msra.gmra.mxu2 %v1292_v46  ;;  %286 = vmatpush.msrb.mxu0 %v169_v52  ;;  %v1432_v52 = vand.u32 4294901760, %v58_v36 }
  0x24   :  { %309 = vmatpush.msrb.mxu1 %v1109_v10  ;;  %344 = vmatpush.msrb.mxu2 %v1283_v44  ;;  %v74_v10 = vld [vmem:[%s1716_s4 + $0xd0] sm:$0xff] }
  0x25   :  { %113 = vmatmul.f32.vlgmr.msra.gmra.mxu0 %v1337_v18  ;;  %243 = vmatmul.f32.vlgmr.msra.gmra.mxu3 %v1311_v15  ;;  %v1379_v19 = vand.u32 4294901760, %v74_v10 }
  0x26   :  { %311 = vmatpush.msrb.mxu1 %v1111_v11  ;;  %425 = vmatpush.msra.mxu0 %v1207_v49  ;;  %v1369_v11 = vand.u32 4294901760, %v78_v9  ;;  %v1423_v49 = vsub.f32 %v66_v20, %v1396_v27  ;;  %v55_v20 = vld [vmem:[%s1716_s4 + $0x38] sm:$0xff] }
  0x27   :  { %495 = vmatpush.msra.mxu2 %v364_v58  ;;  %409 = vmatpush.msrb.mxu3 %v408_v5  ;;  %v1404_v29 = vsub.f32 %v74_v10, %v1379_v19  ;;  %v50_v58 = vld [vmem:[%s1716_s4 + $0x10] sm:$0xff] }
  0x28   :  { %313 = vmatpush.msrb.mxu1 %v1130_v17  ;;  %428 = vmatpush.msra.mxu0 %v1212_v51  ;;  %v70_v17 = vld [vmem:[%s1716_s4 + $0xb0] sm:$0xff]  ;;  %v1391_v26 = vsub.f32 %v78_v9, %v1369_v11  ;;  %v1470_v12 = vand.u32 4294901760, %v50_v58  ;;  %v1546_v9 = vsub.f32 %v67_v38, %v1520_v14 }
  0x29   :  { %174 = vmatmul.f32.vlgmr.msra.gmra.mxu1 %v1274_v37  ;;  %499 = vmatpush.msra.mxu2 %v370_v59  ;;  %v607_v51 = vand.u32 4294901760, %v1404_v29 }
  0x2a   :  { %538 = vmatpush.msra.mxu3 %v1172_v34  ;;  %315 = vmatpush.msrb.mxu1 %v1141_v21  ;;  %v1386_v21 = vand.u32 4294901760, %v70_v17  ;;  %v601_v41 = vand.u32 4294901760, %v1391_v26  ;;  %v1503_v43 = vsub.f32 %v50_v58, %v1470_v12  ;;  %v51_v58 = vld [vmem:[%s1716_s4 + $0x18] sm:$0xff] }
  0x2b   :  { %431 = vmatpush.msra.mxu0 %v1233_v60  ;;  %503 = vmatpush.msra.mxu2 %v376_v7  ;;  %v608_v6 = vsub.f32 %v1404_v29, %v607_v51  ;;  %v1468_v7 = vsub.f32 %v58_v36, %v1432_v52 }
  0x2c   :  { %462 = vmatpush.msra.mxu1 %v1172_v34  ;;  %540 = vmatpush.msra.mxu3 %v1190_v42  ;;  %v1409_v34 = vsub.f32 %v70_v17, %v1386_v21  ;;  %v602_v59 = vsub.f32 %v1391_v26, %v601_v41  ;;  %v643_v62 = vand.u32 4294901760, %v1503_v43  ;;  %v1553_v17 = vand.u32 4294901760, %v59_v2 }
  0x2d   :  { %434 = vmatpush.msra.mxu0 %v1241_v63  ;;  %507 = vmatpush.msra.mxu2 %v382_v22  ;;  %v631_v40 = vand.u32 4294901760, %v1468_v7 }
  0x2e   :  { %464 = vmatpush.msra.mxu1 %v1190_v42  ;;  %542 = vmatpush.msra.mxu3 %v1209_v50  ;;  %v1418_v42 = vand.u32 4294901760, %v62_v28  ;;  %v603_v22 = vand.u32 4294901760, %v602_v59  ;;  %v644_v36 = vsub.f32 %v1503_v43, %v643_v62 }
  0x2f   :  { %350 = vmatmul.f32.vlgmr.msrb.gmra.mxu2 %v1337_v18  ;;  %288 = vmatmul.f32.vlgmr.msrb.gmra.mxu0 %v1274_v37  ;;  %v632_v24 = vsub.f32 %v1468_v7, %v631_v40 }
  0x30   :  { %437 = vmatpush.msra.mxu0 %v1244_v0  ;;  %466 = vmatpush.msra.mxu1 %v1209_v50  ;;  %v54_v50 = vld [vmem:[%s1716_s4 + $0x30] sm:$0xff]  ;;  %v1450_v60 = vsub.f32 %v62_v28, %v1418_v42 }
  0x31   :  { %511 = vmatpush.msra.mxu2 %v388_v35  ;;  %544 = vmatpush.msra.mxu3 %v1217_v53  ;;  %v1452_v63 = vand.u32 4294901760, %v54_v50  ;;  %v633_v28 = vand.u32 4294901760, %v632_v24 }
  0x32   :  { %411 = vmatmul.f32.vlgmr.msrb.gmra.mxu3 %v1274_v37  ;;  %317 = vmatmul.f32.vlgmr.msrb.gmra.mxu1 %v1274_v37  ;;  %v625_v30 = vand.u32 4294901760, %v1450_v60 }
  0x33   :  { %440 = vmatpush.msra.mxu0 %v1247_v1  ;;  %468 = vmatpush.msra.mxu1 %v1217_v53  ;;  %v79_v53 = vld [vmem:[%s1716_s4 + $0xf8] sm:$0xff]  ;;  %v1484_v31 = vsub.f32 %v54_v50, %v1452_v63 }
  0x34   :  { %515 = vmatpush.msra.mxu2 %v394_v39  ;;  %546 = vmatpush.msra.mxu3 %v1219_v54  ;;  %v1457_v0 = vand.u32 4294901760, %v79_v53  ;;  %v75_v1 = vld [vmem:[%s1716_s4 + $0xd8] sm:$0xff]  ;;  %v609_v39 = vand.u32 4294901760, %v608_v6  ;;  %v856_v6 = vand.u32 4294901760, %v1546_v9 }
  0x35   :  { %443 = vmatpush.msra.mxu0 %v1286_v45  ;;  %470 = vmatpush.msra.mxu1 %v1219_v54  ;;  %v613_v54 = vand.u32 4294901760, %v1409_v34  ;;  %v1486_v32 = vand.u32 4294901760, %v75_v1  ;;  %v637_v57 = vand.u32 4294901760, %v1484_v31 }
  0x36   :  { %519 = vmatpush.msra.mxu2 %v400_v61  ;;  %548 = vmatpush.msra.mxu3 %v1221_v55  ;;  %v1494_v35 = vsub.f32 %v79_v53, %v1457_v0 }
  0x37   :  { %446 = vmatpush.msra.mxu0 %v1305_v56  ;;  %472 = vmatpush.msra.mxu1 %v1221_v55  ;;  %v619_v55 = vand.u32 4294901760, %v1423_v49  ;;  %v614_v13 = vsub.f32 %v1409_v34, %v613_v54  ;;  %v1518_v61 = vsub.f32 %v75_v1, %v1486_v32  ;;  %v638_v4 = vsub.f32 %v1484_v31, %v637_v57 }
  0x38   :  { %523 = vmatpush.msra.mxu2 %v406_v25  ;;  %550 = vmatpush.msra.mxu3 %v1257_v8  ;;  %v838_v56 = vand.u32 4294901760, %v1494_v35  ;;  %v1533_v25 = vand.u32 4294901760, %v63_v48 }
  0x39   :  { %525 = vmatmul.f32.vlgmr.msra.gmra.mxu2 %v1274_v37  ;;  %567 = vmatpush.msrb.mxu0 %v1369_v11  ;;  %v620_v33 = vsub.f32 %v1423_v49, %v619_v55  ;;  %v615_v47 = vand.u32 4294901760, %v614_v13  ;;  %v844_v5 = vand.u32 4294901760, %v1518_v61  ;;  %v639_v59 = vand.u32 4294901760, %v638_v4 }
  0x3a   :  { %662 = vmatpush.msrb.mxu2 %v1391_v26  ;;  %474 = vmatpush.msra.mxu1 %v1257_v8  ;;  %v71_v8 = vld [vmem:[%s1716_s4 + $0xb8] sm:$0xff]  ;;  %v839_v10 = vsub.f32 %v1494_v35, %v838_v56  ;;  %v1564_v53 = vsub.f32 %v63_v48, %v1533_v25  ;;  %v1576_v13 = vand.u32 4294901760, %v55_v20 }
  0x3b   :  { %552 = vmatpush.msra.mxu3 %v1283_v44  ;;  %449 = vmatmul.f32.vlgmr.msra.gmra.mxu0 %v1292_v46  ;;  %v1505_v45 = vand.u32 4294901760, %v71_v8  ;;  %v621_v23 = vand.u32 4294901760, %v620_v33  ;;  %v845_v1 = vsub.f32 %v1518_v61, %v844_v5  ;;  %v645_v33 = vand.u32 4294901760, %v644_v36 }
  0x3c   :  { %554 = vmatmul.f32.vlgmr.msra.gmra.mxu3 %v1274_v37  ;;  %569 = vmatpush.msrb.mxu0 %v1379_v19 }
  0x3d   :  { %665 = vmatpush.msrb.mxu2 %v1404_v29  ;;  %699 = vmatpush.msrb.mxu3 %v1369_v11  ;;  %v1531_v16 = vsub.f32 %v71_v8, %v1505_v45  ;;  %v840_v8 = vand.u32 4294901760, %v839_v10  ;;  %v846_v48 = vand.u32 4294901760, %v845_v1 }
  0x3e   :  { %476 = vmatpush.msra.mxu1 %v1283_v44  ;;  %571 = vmatpush.msrb.mxu0 %v1386_v21  ;;  %v626_v44 = vsub.f32 %v1450_v60, %v625_v30 }
  0x3f   :  { %480 = vmatmul.f32.vlgmr.msra.gmra.mxu1 %v1311_v15  ;;  %668 = vmatpush.msrb.mxu2 %v1409_v34  ;;  %v850_v50 = vand.u32 4294901760, %v1531_v16 }
  0x40   :  { %604 = vmatpush.msrb.mxu1 %v603_v22  ;;  %701 = vmatpush.msrb.mxu3 %v1379_v19  ;;  %v627_v3 = vand.u32 4294901760, %v626_v44  ;;  %v1581_v22 = vsub.f32 %v59_v2, %v1553_v17  ;;  %v857_v44 = vsub.f32 %v1546_v9, %v856_v6 }
  0x41   :  { %573 = vmatpush.msrb.mxu0 %v1396_v27  ;;  %671 = vmatpush.msrb.mxu2 %v1423_v49  ;;  %v851_v38 = vsub.f32 %v1531_v16, %v850_v50 }
  0x42   :  { %610 = vmatpush.msrb.mxu1 %v609_v39  ;;  %703 = vmatpush.msrb.mxu3 %v1386_v21  ;;  %v862_v39 = vand.u32 4294901760, %v1564_v53  ;;  %v868_v26 = vand.u32 4294901760, %v1581_v22  ;;  %v858_v29 = vand.u32 4294901760, %v857_v44 }
  0x43   :  { %575 = vmatpush.msrb.mxu0 %v1418_v42  ;;  %674 = vmatpush.msrb.mxu2 %v1450_v60 }
  0x44   :  { %616 = vmatpush.msrb.mxu1 %v615_v47  ;;  %705 = vmatpush.msrb.mxu3 %v1396_v27  ;;  %v1588_v47 = vand.u32 4294901760, %v51_v58  ;;  %v863_v24 = vsub.f32 %v1564_v53, %v862_v39 }
  0x45   :  { %577 = vmatpush.msrb.mxu0 %v1432_v52  ;;  %677 = vmatpush.msrb.mxu2 %v1468_v7 }
  0x46   :  { %622 = vmatpush.msrb.mxu1 %v621_v23  ;;  %707 = vmatpush.msrb.mxu3 %v1418_v42  ;;  %v1598_v23 = vsub.f32 %v55_v20, %v1576_v13  ;;  %v1608_v2 = vsub.f32 %v51_v58, %v1588_v47  ;;  %v864_v34 = vand.u32 4294901760, %v863_v24 }
  0x47   :  { %579 = vmatpush.msrb.mxu0 %v1452_v63  ;;  %680 = vmatpush.msrb.mxu2 %v1484_v31 }
  0x48   :  { %628 = vmatpush.msrb.mxu1 %v627_v3  ;;  %709 = vmatpush.msrb.mxu3 %v1432_v52  ;;  %v869_v3 = vsub.f32 %v1581_v22, %v868_v26 }
  0x49   :  { %581 = vmatpush.msrb.mxu0 %v1470_v12  ;;  %683 = vmatpush.msrb.mxu2 %v1503_v43 }
  0x4a   :  { %634 = vmatpush.msrb.mxu1 %v633_v28  ;;  %711 = vmatpush.msrb.mxu3 %v1452_v63  ;;  %v870_v49 = vand.u32 4294901760, %v869_v3 }
  0x4b   :  { %732 = vmatpush.msra.mxu0 %v601_v41  ;;  %804 = vmatpush.msra.mxu2 %v1457_v0  ;;  %v852_v41 = vand.u32 4294901760, %v851_v38 }
  0x4c   :  { %640 = vmatpush.msrb.mxu1 %v639_v59  ;;  %713 = vmatpush.msrb.mxu3 %v1470_v12 }
  0x4d   :  { %736 = vmatpush.msra.mxu0 %v607_v51  ;;  %806 = vmatpush.msra.mxu2 %v1486_v32  ;;  %v874_v51 = vand.u32 4294901760, %v1598_v23 }
  0x4e   :  { %841 = vmatpush.msra.mxu3 %v840_v8  ;;  %646 = vmatpush.msrb.mxu1 %v645_v33  ;;  %v23_v8 = vld [vmem:[%s1719_s1 + $0x8] sm:$0x77] }
  0x4f   :  { %740 = vmatpush.msra.mxu0 %v613_v54  ;;  %808 = vmatpush.msra.mxu2 %v1505_v45  ;;  %v21_v33 = vld [vmem:[%s1720_s0 + $0x8] sm:$0x77]  ;;  %vm25_vm3 = vcmp.ne.f32.partialorder %v23_v8, %v23_v8 }
  0x50   :  { %775 = vmatpush.msra.mxu1 %v1369_v11  ;;  %847 = vmatpush.msra.mxu3 %v846_v48  ;;  %v880_v11 = vand.u32 4294901760, %v1608_v2  ;;  %v27_v44 = vsel %vm25_vm3, %v21_v33, %v23_v8 }
  0x51   :  { %744 = vmatpush.msra.mxu0 %v619_v55  ;;  %810 = vmatpush.msra.mxu2 %v1520_v14  ;;  %v22_v55 = vld [vmem:[%s1719_s1] sm:$0x77] }
  0x52   :  { %777 = vmatpush.msra.mxu1 %v1379_v19  ;;  %853 = vmatpush.msra.mxu3 %v852_v41  ;;  %v875_v19 = vsub.f32 %v1598_v23, %v874_v51  ;;  %v881_v54 = vsub.f32 %v1608_v2, %v880_v11  ;;  %vm24_vm1 = vcmp.ne.f32.partialorder %v22_v55, %v22_v55 }
  0x53   :  { %748 = vmatpush.msra.mxu0 %v625_v30  ;;  %812 = vmatpush.msra.mxu2 %v1533_v25 }
  0x54   :  { %779 = vmatpush.msra.mxu1 %v1386_v21  ;;  %859 = vmatpush.msra.mxu3 %v858_v29  ;;  %v876_v21 = vand.u32 4294901760, %v875_v19  ;;  %v29_v29 = vsub.f32 %v21_v33, %v27_v44 }
  0x55   :  { %752 = vmatpush.msra.mxu0 %v631_v40  ;;  %814 = vmatpush.msra.mxu2 %v1553_v17 }
  0x56   :  { %781 = vmatpush.msra.mxu1 %v1396_v27  ;;  %865 = vmatpush.msra.mxu3 %v864_v34  ;;  %v882_v27 = vand.u32 4294901760, %v881_v54 }
  0x57   :  { %686 = vmatmul.f32.vlgmr.msrb.gmra.mxu2 %v1292_v46  ;;  %756 = vmatpush.msra.mxu0 %v637_v57 }
  0x58   :  { %783 = vmatpush.msra.mxu1 %v1418_v42  ;;  %816 = vmatpush.msra.mxu2 %v1576_v13 }
  0x59   :  { %871 = vmatpush.msra.mxu3 %v870_v49  ;;  %587 = vmatmul.f32.vlgmr.msrb.gmra.mxu0 %v1337_v18 }
  0x5a   :  { %717 = vmatmul.f32.vlgmr.msrb.gmra.mxu3 %v1311_v15  ;;  %760 = vmatpush.msra.mxu0 %v643_v62 }
  0x5b   :  { %785 = vmatpush.msra.mxu1 %v1432_v52  ;;  %818 = vmatpush.msra.mxu2 %v1588_v47 }
  0x5c   :  { %877 = vmatpush.msra.mxu3 %v876_v21  ;;  %899 = vmatpush.msrb.mxu0 %v1494_v35 }
  0x5d   :  { %969 = vmatpush.msrb.mxu2 %v838_v56  ;;  %648 = vmatmul.f32.vlgmr.msrb.gmra.mxu1 %v1274_v37 }
  0x5e   :  { %787 = vmatpush.msra.mxu1 %v1452_v63  ;;  %883 = vmatpush.msra.mxu3 %v882_v27 }
  0x5f   :  { %902 = vmatpush.msrb.mxu0 %v1518_v61  ;;  %973 = vmatpush.msrb.mxu2 %v844_v5 }
  0x60   :  { %1012 = vmatpush.msrb.mxu3 %v1457_v0  ;;  %789 = vmatpush.msra.mxu1 %v1470_v12 }
  0x61   :  { %905 = vmatpush.msrb.mxu0 %v1531_v16  ;;  %977 = vmatpush.msrb.mxu2 %v850_v50 }
  0x62   :  { %936 = vmatpush.msrb.mxu1 %v1457_v0  ;;  %1014 = vmatpush.msrb.mxu3 %v1486_v32 }
  0x63   :  { %908 = vmatpush.msrb.mxu0 %v1546_v9  ;;  %981 = vmatpush.msrb.mxu2 %v856_v6 }
  0x64   :  { %938 = vmatpush.msrb.mxu1 %v1486_v32  ;;  %1016 = vmatpush.msrb.mxu3 %v1505_v45 }
  0x65   :  { %762 = vmatmul.f32.vlgmr.msra.gmra.mxu0 %v1274_v37  ;;  %824 = vmatmul.f32.vlgmr.msra.gmra.mxu2 %v1337_v18 }
  0x66   :  { %885 = vmatmul.f32.vlgmr.msra.gmra.mxu3 %v1274_v37  ;;  %911 = vmatpush.msrb.mxu0 %v1564_v53 }
  0x67   :  { %940 = vmatpush.msrb.mxu1 %v1505_v45  ;;  %985 = vmatpush.msrb.mxu2 %v862_v39 }
  0x68   :  { %1018 = vmatpush.msrb.mxu3 %v1520_v14  ;;  %791 = vmatmul.f32.vlgmr.msra.gmra.mxu1 %v1274_v37 }
  0x69   :  { %914 = vmatpush.msrb.mxu0 %v1581_v22  ;;  %942 = vmatpush.msrb.mxu1 %v1520_v14 }
  0x6a   :  { %989 = vmatpush.msrb.mxu2 %v868_v26  ;;  %1020 = vmatpush.msrb.mxu3 %v1533_v25 }
  0x6b   :  { %917 = vmatpush.msrb.mxu0 %v1598_v23  ;;  %944 = vmatpush.msrb.mxu1 %v1533_v25 }
  0x6c   :  { %993 = vmatpush.msrb.mxu2 %v874_v51  ;;  %1022 = vmatpush.msrb.mxu3 %v1553_v17 }
  0x6d   :  { %920 = vmatpush.msrb.mxu0 %v1608_v2  ;;  %946 = vmatpush.msrb.mxu1 %v1553_v17 }
  0x6e   :  { %997 = vmatpush.msrb.mxu2 %v880_v11  ;;  %1024 = vmatpush.msrb.mxu3 %v1576_v13 }
  0x6f   :  { %923 = vmatmul.f32.vlgmr.msrb.gmra.mxu0 %v1292_v46  ;;  %999 = vmatmul.f32.vlgmr.msrb.gmra.mxu2 %v1274_v37  ;;  %v30_v46 = vld [vmem:[%s1718_s2] sm:$0xf] }
  0x70   :  { %948 = vmatpush.msrb.mxu1 %v1576_v13  ;;  %1026 = vmatpush.msrb.mxu3 %v1588_v47  ;;  %v33_v12 = vperm.slane %v30_v46, 1  ;;  %v32_v40 = vperm.slane %v30_v46, 0  ;;  %v35_v38 = vperm.slane %v30_v46, 3  ;;  %v34_v41 = vperm.slane %v30_v46, 2 }
  0x71   :  { %1028 = vmatmul.f32.vlgmr.msrb.gmra.mxu3 %v1274_v37 }
  0x72   :  { %950 = vmatpush.msrb.mxu1 %v1588_v47  ;;  %v36_v43 = vrot.slane %v33_v12, 4  ;;  %v37_v24 = vrot.slane %v35_v38, 4 }
  0x73   :  { %954 = vmatmul.f32.vlgmr.msrb.gmra.mxu1 %v1311_v15  ;;  %v20_v15 = vld [vmem:[%s1720_s0] sm:$0x77] }
  0x74   :  { %v26_v35 = vsel %vm24_vm1, %v20_v15, %v22_v55  ;;  %v39_v56 = vsel %vm38_vm2, %v32_v40, %v36_v43  ;;  %v40_v34 = vsel %vm38_vm2, %v34_v41, %v37_v24 }
  0x75   :  { %v28_v61 = vsub.f32 %v20_v15, %v26_v35  ;;  %v44_v54 = vmul.f32 %v40_v34, %v29_v29 }
  0x77   :  { %v43_v4 = vmul.f32 %v39_v56, %v28_v61 }
  0x79   :  { %v45_v20 = vand.u32 2147483647, %v43_v4 }
  0xa2   :  { %v114_v18 = vpop.f32.mrf.mxu0 }
  0xa6   :  { %v175_v42 = vpop.f32.mrf.mxu1  ;;  %v213_v52 = vpop.f32.mrf.mxu2 }
  0xa7   :  { %v176_v37 = vadd.f32 %v175_v42, %v114_v18 }
  0xa8   :  { %v244_v60 = vpop.f32.mrf.mxu3 }
  0xa9   :  { %v214_v32 = vadd.f32 %v213_v52, %v176_v37  ;;  %v46_v52 = vand.u32 2147483647, %v44_v54 }
  0xab   :  { %v245_v14 = vadd.f32 %v244_v60, %v214_v32 }
  0xac   :  { %v289_v63 = vpop.f32.mrf.mxu0 }
  0xad   :  { %v290_v5 = vadd.f32 %v289_v63, %v245_v14 }
  0xaf   :  { %v318_v0 = vpop.f32.mrf.mxu1 }
  0xb0   :  { %v319_v28 = vadd.f32 %v318_v0, %v290_v5 }
  0xb2   :  { %v351_v7 = vpop.f32.mrf.mxu2 }
  0xb5   :  { %v412_v30 = vpop.f32.mrf.mxu3 }
  0xb6   :  { %v413_v31 = vadd.f32 %v412_v30, %v351_v7 }
  0xb8   :  { %v450_v45 = vpop.f32.mrf.mxu0 }
  0xb9   :  { %v451_v57 = vadd.f32 %v450_v45, %v413_v31 }
  0xbc   :  { %v481_v62 = vpop.f32.mrf.mxu1  ;;  %v526_v16 = vpop.f32.mrf.mxu2 }
  0xbd   :  { %v482_v25 = vadd.f32 %v481_v62, %v451_v57 }
  0xbf   :  { %v527_v9 = vadd.f32 %v526_v16, %v482_v25  ;;  %v555_v10 = vpop.f32.mrf.mxu3 }
  0xc1   :  { %v556_v17 = vadd.f32 %v555_v10, %v527_v9 }
  0xc3   :  { %v1036_v36 = vrot.slane %v556_v17, 4 }
  0xc5   :  { %v1038_v50 = vsel %vm38_vm2, %v319_v28, %v1036_v36 }
  0xc6   :  { %v1042_v53 = vmul.f32 %v1038_v50, %v45_v20 }
  0xc8   :  { %1044 = vst [vmem:[%s1721_s5] sm:$0x77] %v1042_v53 }
  0xd6   :  { %v588_v58 = vpop.f32.mrf.mxu0 }
  0xda   :  { %v649_v59 = vpop.f32.mrf.mxu1  ;;  %v687_v6 = vpop.f32.mrf.mxu2 }
  0xdb   :  { %v650_v22 = vadd.f32 %v649_v59, %v588_v58 }
  0xdd   :  { %v718_v1 = vpop.f32.mrf.mxu3  ;;  %v688_v23 = vadd.f32 %v687_v6, %v650_v22 }
  0xdf   :  { %v719_v51 = vadd.f32 %v718_v1, %v688_v23 }
  0xe2   :  { %v763_v13 = vpop.f32.mrf.mxu0 }
  0xe3   :  { %v764_v21 = vadd.f32 %v763_v13, %v719_v51 }
  0xe5   :  { %v792_v39 = vpop.f32.mrf.mxu1 }
  0xe6   :  { %v793_v60 = vadd.f32 %v792_v39, %v764_v21 }
  0xe8   :  { %v825_v47 = vpop.f32.mrf.mxu2 }
  0xe9   :  { %v886_v48 = vpop.f32.mrf.mxu3 }
  0xea   :  { %v887_v26 = vadd.f32 %v886_v48, %v825_v47 }
  0xec   :  { %v924_v2 = vpop.f32.mrf.mxu0 }
  0xed   :  { %v925_v3 = vadd.f32 %v924_v2, %v887_v26 }
  0xf0   :  { %v955_v11 = vpop.f32.mrf.mxu1 }
  0xf1   :  { %v956_v19 = vadd.f32 %v955_v11, %v925_v3 }
  0xf2   :  { %v1000_v49 = vpop.f32.mrf.mxu2 }
  0xf3   :  { %v1001_v27 = vadd.f32 %v1000_v49, %v956_v19 }
  0xf4   :  { %v1029_v18 = vpop.f32.mrf.mxu3 }
  0xf5   :  { %v1030_v42 = vadd.f32 %v1029_v18, %v1001_v27 }
  0xf7   :  { %v1037_v63 = vrot.slane %v1030_v42, 4 }
  0xf9   :  { %v1039_v46 = vsel %vm38_vm2, %v793_v60, %v1037_v63 }
  0xfa   :  { %v1043_v55 = vmul.f32 %v1039_v46, %v46_v52 }
  0xfc   :  { %1048 = vst.msk [vmem:[%s1721_s5 + $0x8] sm:$0x77] %vm1047_vm6, %v1043_v55 }

</bundles_post_ra>
